<compile_context>
chip_gen: v7x
topology: tpu7x:2x2x1
jax: 0.10.0
libtpu: 0.0.40
codegen_flags: <defaults>
</compile_context>

<pallas_src>
import math

import jax
import jax.numpy as jnp
from jax.experimental import pallas as pl
from jax.experimental.pallas import tpu as pltpu


def pinn_kernel(x_ref, t_ref, w1x_ref, w1t_ref, b1_ref, w2_ref, b2_ref,
                w3_ref, b3_ref, o_ref):
    x = x_ref[...]                       # (1, T)  batch in lanes
    t = t_ref[...]                       # (1, T)

    # Layer 1: Linear(2, H). K=2 contraction -> two broadcast FMAs on the VPU
    # instead of a degenerate MXU matmul.
    h = jnp.tanh(w1x_ref[...] * x + w1t_ref[...] * t + b1_ref[...])   # (H, T) f32

    # Layer 2: Linear(H, H) -- the only real matmul. MXU, (optionally bf16)
    # inputs, f32 accumulation.
    h = jnp.dot(w2_ref[...], h.astype(w2_ref.dtype),
                preferred_element_type=jnp.float32)
    h = jnp.tanh(h + b2_ref[...])                                      # (H, T) f32

    # Layer 3: Linear(H, 1). N=1 -> VPU multiply + cross-sublane (XLU) reduce,
    # giving a lane-dense (1, T) output store.
    o = jnp.sum(w3_ref[...] * h, axis=0, keepdims=True) + b3_ref[0, 0]
    o_ref[...] = o.astype(o_ref.dtype)


def _round_up(x, m):
    return ((x + m - 1) // m) * m


def pinn_forward(x, t, params, *, tile_n=2048, matmul_dtype=jnp.bfloat16):
    """x: (N, 1) f32, t: (N, 1) f32 -> (N, 1) f32.

    params holds PyTorch-shaped tensors:
      w1 (H, 2), b1 (H,), w2 (H, H), b2 (H,), w3 (1, H), b3 (1,)
    """
    w1, b1, w2, b2, w3, b3 = params
    hid = w1.shape[0]
    n = x.shape[0]

    # Batch-in-lanes: (N, 1) column vectors become (1, N) rows (free reshape).
    xr = jnp.reshape(x, (1, n))
    tr = jnp.reshape(t, (1, n))

    # Lane-friendly tile (multiple of 128), capped by the padded batch; pad the
    # batch to a multiple of the tile instead of asserting divisibility.
    tile = _round_up(min(int(tile_n), _round_up(n, 128)), 128)
    n_pad = _round_up(n, tile)
    if n_pad != n:
        pad = ((0, 0), (0, n_pad - n))
        xr = jnp.pad(xr, pad)
        tr = jnp.pad(tr, pad)
    grid = (n_pad // tile,)

    # Free reshapes / static column splits, done once on the XLA side.
    w1x = w1[:, 0:1]                         # (H, 1)
    w1t = w1[:, 1:2]                         # (H, 1)
    b1c = jnp.reshape(b1, (hid, 1))          # (H, 1)
    w2m = w2.astype(matmul_dtype)            # (H, H)   bf16 on the fast path
    b2c = jnp.reshape(b2, (hid, 1))          # (H, 1)
    w3c = jnp.reshape(w3, (hid, 1))          # (H, 1)   row -> column (free)
    b3s = jnp.reshape(b3, (1, 1))            # (1, 1)   scalar -> SMEM

    full = lambda i: (0, 0)                  # weights/biases are grid-invariant
    batch_blk = pl.BlockSpec((1, tile), lambda i: (0, i))

    out = pl.pallas_call(
        pinn_kernel,
        out_shape=jax.ShapeDtypeStruct((1, n_pad), jnp.float32),
        grid=grid,
        in_specs=[
            batch_blk,                                        # x row
            batch_blk,                                        # t row
            pl.BlockSpec((hid, 1), full),                     # W1[:, 0:1]
            pl.BlockSpec((hid, 1), full),                     # W1[:, 1:2]
            pl.BlockSpec((hid, 1), full),                     # b1
            pl.BlockSpec((hid, hid), full),                   # W2
            pl.BlockSpec((hid, 1), full),                     # b2
            pl.BlockSpec((hid, 1), full),                     # W3 column
            pl.BlockSpec(memory_space=pltpu.MemorySpace.SMEM),  # b3 scalar
        ],
        out_specs=batch_blk,
        compiler_params=pltpu.CompilerParams(
            dimension_semantics=("parallel",),
        ),
    )(xr, tr, w1x, w1t, b1c, w2m, b2c, w3c, b3s)

    return jnp.reshape(out[:, :n], (n, 1))


def init_params(key):
    """Deterministic init mirroring nn.Linear defaults: U(-1/sqrt(fan_in), +).
    Weights are stored with the PyTorch (out_features, in_features) convention."""
    ks = jax.random.split(key, 6)

    def linear(kw, kb, fan_in, fan_out):
        bound = 1.0 / math.sqrt(fan_in)
        w = jax.random.uniform(kw, (fan_out, fan_in), jnp.float32, -bound, bound)
        b = jax.random.uniform(kb, (fan_out,), jnp.float32, -bound, bound)
        return w, b

    w1, b1 = linear(ks[0], ks[1], 2, 64)
    w2, b2 = linear(ks[2], ks[3], 64, 64)
    w3, b3 = linear(ks[4], ks[5], 64, 1)
    return (w1, b1, w2, b2, w3, b3)


def pinn_reference(x, t, params, matmul_dtype=jnp.float32):
    """Pure-JAX reference, mathematically identical to the PyTorch module
    (Linear(2,H) -> tanh -> Linear(H,H) -> tanh -> Linear(H,1)).
    The hidden matmul operands are optionally cast to `matmul_dtype` (with f32
    accumulation) to mirror the kernel's bf16 MXU path."""
    w1, b1, w2, b2, w3, b3 = params
    # Linear(2, H): h[n, j] = x[n] * w1[j, 0] + t[n] * w1[j, 1] + b1[j]
    h = jnp.tanh(x * w1[:, 0] + t * w1[:, 1] + b1)                  # (N, H)
    # Linear(H, H)
    h = jnp.dot(h.astype(matmul_dtype), w2.T.astype(matmul_dtype),
                preferred_element_type=jnp.float32)
    h = jnp.tanh(h + b2)                                            # (N, H)
    # Linear(H, 1): out[n] = sum_j h[n, j] * w3[0, j] + b3
    return jnp.sum(h * w3[0], axis=1, keepdims=True) + b3           # (N, 1)


if __name__ == "__main__":
    key = jax.random.PRNGKey(0)
    kp, kx, kt = jax.random.split(key, 3)

    params = init_params(kp)
    N = 1000  # deliberately not a multiple of the tile; exercises pad + multi-step grid
    x = jax.random.uniform(kx, (N, 1), jnp.float32, -1.0, 1.0)
    t = jax.random.uniform(kt, (N, 1), jnp.float32, 0.0, 1.0)

    # f32 MXU path: tight match against the PyTorch-semantics reference.
    out_f32 = jax.block_until_ready(
        pinn_forward(x, t, params, tile_n=256, matmul_dtype=jnp.float32))
    ref_f32 = pinn_reference(x, t, params, jnp.float32)
    assert out_f32.shape == (N, 1) and out_f32.dtype == jnp.float32
    assert jnp.allclose(out_f32, ref_f32, atol=1e-4, rtol=1e-4), "f32 mismatch"

    # bf16 MXU fast path (default): compare against the bf16-mirrored reference
    # (tight-ish) and the true f32 reference (loose sanity).
    out_bf16 = jax.block_until_ready(
        pinn_forward(x, t, params, tile_n=256, matmul_dtype=jnp.bfloat16))
    ref_bf16 = pinn_reference(x, t, params, jnp.bfloat16)
    assert out_bf16.shape == (N, 1) and out_bf16.dtype == jnp.float32
    assert jnp.allclose(out_bf16, ref_bf16, atol=5e-3, rtol=5e-3), "bf16 mismatch"
    assert jnp.allclose(out_bf16, ref_f32, atol=2e-2, rtol=2e-2), "bf16 sanity"

    print("KERNEL_OK")
</pallas_src>

<mosaic_0001>
module attributes {stable_mosaic.version = 11 : i64} {
  func.func @pinn_kernel(%arg0: i32, %arg1: memref<1x256xf32, #tpu.memory_space<vmem>>, %arg2: memref<1x256xf32, #tpu.memory_space<vmem>>, %arg3: memref<64x1xf32, #tpu.memory_space<vmem>>, %arg4: memref<64x1xf32, #tpu.memory_space<vmem>>, %arg5: memref<64x1xf32, #tpu.memory_space<vmem>>, %arg6: memref<64x64xf32, #tpu.memory_space<vmem>>, %arg7: memref<64x1xf32, #tpu.memory_space<vmem>>, %arg8: memref<64x1xf32, #tpu.memory_space<vmem>>, %arg9: memref<1x1xf32, #tpu.memory_space<smem>>, %arg10: memref<1x256xf32, #tpu.memory_space<vmem>>) attributes {dimension_semantics = [#tpu.dimension_semantics<parallel>], iteration_bounds = array<i64: 4>, scalar_prefetch = 0 : i64, scratch_operands = 0 : i64, tpu.core_type = #tpu.core_type<tc>, window_params = [{transform_indices = @transform_0, window_bounds = array<i64: 1, 256>}, {transform_indices = @transform_1, window_bounds = array<i64: 1, 256>}, {pipeline_mode = #tpu.pipeline_mode<synchronous>, transform_indices = @transform_2, window_bounds = array<i64: 64, 1>}, {pipeline_mode = #tpu.pipeline_mode<synchronous>, transform_indices = @transform_3, window_bounds = array<i64: 64, 1>}, {pipeline_mode = #tpu.pipeline_mode<synchronous>, transform_indices = @transform_4, window_bounds = array<i64: 64, 1>}, {pipeline_mode = #tpu.pipeline_mode<synchronous>, transform_indices = @transform_5, window_bounds = array<i64: 64, 64>}, {pipeline_mode = #tpu.pipeline_mode<synchronous>, transform_indices = @transform_6, window_bounds = array<i64: 64, 1>}, {pipeline_mode = #tpu.pipeline_mode<synchronous>, transform_indices = @transform_7, window_bounds = array<i64: 64, 1>}, {transform_indices = @transform_8, window_bounds = array<i64: 1, 1>}, {transform_indices = @transform_9, window_bounds = array<i64: 1, 256>}]} {
    %c0 = arith.constant 0 : index
    %c0_0 = arith.constant 0 : index
    %0 = vector.load %arg1[%c0, %c0_0] : memref<1x256xf32, #tpu.memory_space<vmem>>, vector<1x256xf32>
    %c0_1 = arith.constant 0 : index
    %c0_2 = arith.constant 0 : index
    %1 = vector.load %arg2[%c0_1, %c0_2] : memref<1x256xf32, #tpu.memory_space<vmem>>, vector<1x256xf32>
    %c0_3 = arith.constant 0 : index
    %c0_4 = arith.constant 0 : index
    %2 = vector.load %arg3[%c0_3, %c0_4] : memref<64x1xf32, #tpu.memory_space<vmem>>, vector<64x1xf32>
    %3 = vector.broadcast %2 : vector<64x1xf32> to vector<64x256xf32>
    %4 = vector.broadcast %0 : vector<1x256xf32> to vector<64x256xf32>
    %5 = arith.mulf %3, %4 : vector<64x256xf32>
    %c0_5 = arith.constant 0 : index
    %c0_6 = arith.constant 0 : index
    %6 = vector.load %arg4[%c0_5, %c0_6] : memref<64x1xf32, #tpu.memory_space<vmem>>, vector<64x1xf32>
    %7 = vector.broadcast %6 : vector<64x1xf32> to vector<64x256xf32>
    %8 = vector.broadcast %1 : vector<1x256xf32> to vector<64x256xf32>
    %9 = arith.mulf %7, %8 : vector<64x256xf32>
    %10 = arith.addf %5, %9 : vector<64x256xf32>
    %c0_7 = arith.constant 0 : index
    %c0_8 = arith.constant 0 : index
    %11 = vector.load %arg5[%c0_7, %c0_8] : memref<64x1xf32, #tpu.memory_space<vmem>>, vector<64x1xf32>
    %12 = vector.broadcast %11 : vector<64x1xf32> to vector<64x256xf32>
    %13 = arith.addf %10, %12 : vector<64x256xf32>
    %14 = math.tanh %13 : vector<64x256xf32>
    %c0_9 = arith.constant 0 : index
    %c0_10 = arith.constant 0 : index
    %15 = vector.load %arg6[%c0_9, %c0_10] : memref<64x64xf32, #tpu.memory_space<vmem>>, vector<64x64xf32>
    %cst = arith.constant dense<0.000000e+00> : vector<64x256xf32>
    %16 = tpu.matmul %15, %14, %cst {dimension_numbers = #tpu.dot_dimension_numbers<[1], [0], [0], [1], [0, 0, 1, 1], [], []>} : vector<64x64xf32>, vector<64x256xf32>, vector<64x256xf32> -> vector<64x256xf32>
    %c0_11 = arith.constant 0 : index
    %c0_12 = arith.constant 0 : index
    %17 = vector.load %arg7[%c0_11, %c0_12] : memref<64x1xf32, #tpu.memory_space<vmem>>, vector<64x1xf32>
    %18 = vector.broadcast %17 : vector<64x1xf32> to vector<64x256xf32>
    %19 = arith.addf %16, %18 : vector<64x256xf32>
    %20 = math.tanh %19 : vector<64x256xf32>
    %c0_13 = arith.constant 0 : index
    %c0_14 = arith.constant 0 : index
    %21 = vector.load %arg8[%c0_13, %c0_14] : memref<64x1xf32, #tpu.memory_space<vmem>>, vector<64x1xf32>
    %22 = vector.broadcast %21 : vector<64x1xf32> to vector<64x256xf32>
    %23 = arith.mulf %22, %20 : vector<64x256xf32>
    %cst_15 = arith.constant dense<0.000000e+00> : vector<256xf32>
    %24 = vector.multi_reduction <add>, %23, %cst_15 [0] : vector<64x256xf32> to vector<256xf32>
    %25 = vector.shape_cast %24 : vector<256xf32> to vector<1x256xf32>
    %c0_16 = arith.constant 0 : index
    %c0_17 = arith.constant 0 : index
    %26 = memref.load %arg9[%c0_16, %c0_17] : memref<1x1xf32, #tpu.memory_space<smem>>
    %27 = vector.broadcast %26 : f32 to vector<1x256xf32>
    %28 = arith.addf %25, %27 : vector<1x256xf32>
    %c0_18 = arith.constant 0 : index
    %c0_19 = arith.constant 0 : index
    %29 = vector.load %arg10[%c0_18, %c0_19] : memref<1x256xf32, #tpu.memory_space<vmem>>, vector<1x256xf32>
    tpu.vector_store %arg10[%c0_18, %c0_19], %28 {strides = array<i32>} : memref<1x256xf32, #tpu.memory_space<vmem>>, vector<1x256xf32>,
    return
  }
  func.func @transform_0(%arg0: i32) -> (i32, i32) {
    %c0_i32 = arith.constant 0 : i32
    %c0_i32_0 = arith.constant 0 : i32
    return %c0_i32, %arg0 : i32, i32
  }
  func.func @transform_1(%arg0: i32) -> (i32, i32) {
    %c0_i32 = arith.constant 0 : i32
    %c0_i32_0 = arith.constant 0 : i32
    return %c0_i32, %arg0 : i32, i32
  }
  func.func @transform_2(%arg0: i32) -> (i32, i32) {
    %c0_i32 = arith.constant 0 : i32
    %c0_i32_0 = arith.constant 0 : i32
    %c0_i32_1 = arith.constant 0 : i32
    return %c0_i32, %c0_i32_0 : i32, i32
  }
  func.func @transform_3(%arg0: i32) -> (i32, i32) {
    %c0_i32 = arith.constant 0 : i32
    %c0_i32_0 = arith.constant 0 : i32
    %c0_i32_1 = arith.constant 0 : i32
    return %c0_i32, %c0_i32_0 : i32, i32
  }
  func.func @transform_4(%arg0: i32) -> (i32, i32) {
    %c0_i32 = arith.constant 0 : i32
    %c0_i32_0 = arith.constant 0 : i32
    %c0_i32_1 = arith.constant 0 : i32
    return %c0_i32, %c0_i32_0 : i32, i32
  }
  func.func @transform_5(%arg0: i32) -> (i32, i32) {
    %c0_i32 = arith.constant 0 : i32
    %c0_i32_0 = arith.constant 0 : i32
    %c0_i32_1 = arith.constant 0 : i32
    return %c0_i32, %c0_i32_0 : i32, i32
  }
  func.func @transform_6(%arg0: i32) -> (i32, i32) {
    %c0_i32 = arith.constant 0 : i32
    %c0_i32_0 = arith.constant 0 : i32
    %c0_i32_1 = arith.constant 0 : i32
    return %c0_i32, %c0_i32_0 : i32, i32
  }
  func.func @transform_7(%arg0: i32) -> (i32, i32) {
    %c0_i32 = arith.constant 0 : i32
    %c0_i32_0 = arith.constant 0 : i32
    %c0_i32_1 = arith.constant 0 : i32
    return %c0_i32, %c0_i32_0 : i32, i32
  }
  func.func @transform_8(%arg0: i32) -> (i32, i32) {
    %c0_i32 = arith.constant 0 : i32
    %c0_i32_0 = arith.constant 0 : i32
    %c0_i32_1 = arith.constant 0 : i32
    return %c0_i32, %c0_i32_0 : i32, i32
  }
  func.func @transform_9(%arg0: i32) -> (i32, i32) {
    %c0_i32 = arith.constant 0 : i32
    %c0_i32_0 = arith.constant 0 : i32
    return %c0_i32, %arg0 : i32, i32
  }
}

</mosaic_0001>

<bundles_post_ra>
// kernel: tpu_custom_call.1
= control target key start
LH: loop header
LB: loop body
LE: loop exit
PB: predicated region body
PF: predicated region fallthrough
CT: control target
= control target key end

     0   :  { %s1589_s0 = inlined_call_operand.vmem [shape: f32[1,1024], index: 0, kind: input, shape index: {}]   ;;  %s1590_s1 = inlined_call_operand.vmem [shape: f32[1,1024], index: 1, kind: input, shape index: {}]   ;;  %s1591_s2 = inlined_call_operand.vmem [shape: f32[64,1], index: 2, kind: input, shape index: {}]   ;;  %s1592_s3 = inlined_call_operand.vmem [shape: f32[64,1], index: 3, kind: input, shape index: {}]   ;;  %s1593_s4 = inlined_call_operand.vmem [shape: f32[64,1], index: 4, kind: input, shape index: {}]   ;;  %s1594_s5 = inlined_call_operand.vmem [shape: f32[64,64], index: 5, kind: input, shape index: {}]   ;;  %s1595_s6 = inlined_call_operand.vmem [shape: f32[64,1], index: 6, kind: input, shape index: {}]   ;;  %s1596_s7 = inlined_call_operand.vmem [shape: f32[64,1], index: 7, kind: input, shape index: {}]   ;;  %s1597_s8 = inlined_call_operand.<no memory space> [shape: f32[1,1], index: 8, kind: input, shape index: {}]   ;;  %s1598_s9 = inlined_call_operand.hbm [shape: f32[1,1024], index: 9, kind: output, shape index: {}]  }
   0x1   :  { %14 = sst [smem:[#allocation2]] %s1597_s8 }
   0x2   :  { %15 = vsyncpa [#allocation4], 0 }
   0x3   :  { %17 = vsyncpa [#allocation4 + $0x1], 0  ;;  %s1280_s11 = smov 0   ;;  %s1282_s12 = smov 0  }
   0x4   :  { %s1284_s13 = smov 0   ;;  %s1286_s14 = smov 0  }
   0x5 LB: > { %s1301_s8 = sadd.s32 4294967295, %s1221_s14   ;;  %s1006_s15 = sadd.s32 4294967294, %s1221_s14   ;;  %s1221_s14 = sphi %s1286_s14, %s1604_s14   ;;  %s1217_s13 = sphi %s1284_s13, %s1603_s13   ;;  %s1213_s12 = sphi %s1282_s12, %s1602_s12   ;;  %s1209_s11 = sphi %s1280_s11, %s1601_s11  }
   0x6   : > { %s1305_s16 = sadd.s32 1, %s1221_s14   ;;  %s229_s17 = sadd.s32 1, %s1217_s13 }
   0x7   : > { %s226_s18 = ssub.s32 %s1221_s14, %s1305_s16  ;;  %p239_p0 = scmp.ne.s32.totalorder %s1217_s13, %s1213_s12 }
   0x8   : > { %p227_p1 = scmp.eq.s32.totalorder %s226_s18, 0  ;;  %p240_p2 = scmp.eq.s32.totalorder %s1301_s8, 3 }
   0x9   : > { %p245_p3 = scmp.ne.s32.totalorder %s1213_s12, %s1209_s11  ;;  %p246_p4 = scmp.eq.s32.totalorder %s1006_s15, 3 }
   0xa   : > { %s1316_s19 = scalar_select %p227_p1, %s1217_s13, %s229_s17  }
   0xb   : > { %p1318_p5 = por %p240_p2, %p239_p0  ;;  %p1322_p6 = por %p246_p4, %p245_p3 }
   0xc   : > { %p1009_p7 = scmp.ge.s32.totalorder %s1221_s14, 1  ;;  %p301_p8 = scmp.lt.s32.totalorder %s1221_s14, 5 }
   0xe   : > { %p302_p9 = pnand %p1009_p7, %p301_p8 }
   0xf   : > { %v428_v0 = vld [vmem:[%s1592_s3] sm:$0xff] (!%p302_p9)  ;;  %v1223_v2 = vmov (!%p302_p9), 0   ;;  %v429_v3 = vld [vmem:[%s1592_s3 + $0x8] sm:$0xff] (!%p302_p9)  ;;  %v356_v5 = vld [vmem:[%s1591_s2 + $0x18] sm:$0xff] (!%p302_p9)  ;;  %v1224_v37 = vmov (!%p302_p9), 0.0   ;;  %s1011_s24 = sshll.u32 (!%p302_p9), %s1301_s8, 1  ;;  %v402_v42 = vlaneseq (!%p302_p9) }
  0x10   : > { %305 = sbr.rel (%p302_p9) target bundleno = 496 (0x1f0), region = 56  ;;  %v353_v1 = vld [vmem:[%s1591_s2] sm:$0xff] (!%p302_p9)  ;;  %1094 = vset.pattern.permute.xlu1 (!%p302_p9), %v1223_v2  ;;  %1093 = vset.pattern.permute.xlu0 (!%p302_p9), %v1223_v2  ;;  %v354_v4 = vld [vmem:[%s1591_s2 + $0x8] sm:$0xff] (!%p302_p9)  ;;  %v355_v6 = vld [vmem:[%s1591_s2 + $0x10] sm:$0xff] (!%p302_p9)  ;;  %p341_p10 = scmp.lt.s32.totalorder (!%p302_p9), %s1011_s24, 7  ;;  %vm655_vm0 = vcmask (!%p302_p9), 523264  }
  0x11   : > { %438 = vperm.xlu1 (!%p302_p9), %1094, %v428_v0   ;;  %363 = vperm.xlu0 (!%p302_p9), %1093, %v353_v1   ;;  %v431_v7 = vld [vmem:[%s1592_s3 + $0x18] sm:$0xff] (!%p302_p9)  ;;  %v430_v8 = vld [vmem:[%s1592_s3 + $0x10] sm:$0xff] (!%p302_p9)  ;;  %v520_v9 = vld [vmem:[%s1593_s4 + $0x8] sm:$0xff] (!%p302_p9)  ;;  %v1452_v43 = vshrl.u32 (!%p302_p9), %v402_v42, 7  ;;  %s899_s18 = sld [smem:[#allocation2]] (!%p302_p9)  ;;  %s337_s22 = sand.u32 (!%p302_p9), 1, %s1213_s12  }
  0x12   : > { %v519_v10 = vld [vmem:[%s1593_s4] sm:$0xff] (!%p302_p9)  ;;  %v358_v11 = vld [vmem:[%s1591_s2 + $0x28] sm:$0xff] (!%p302_p9)  ;;  %v522_v15 = vld [vmem:[%s1593_s4 + $0x18] sm:$0xff] (!%p302_p9)  ;;  %744 = vmatprep.mubr.f32.mxu0 (!%p302_p9), %v1224_v37  ;;  %768 = vmatprep.mubr.f32.mxu1 (!%p302_p9), %v1224_v37  ;;  %s1010_s23 = sshll.u32 (!%p302_p9), %s337_s22, 1  ;;  %vm923_vm1 = vcmp.lt.s32.totalorder (!%p302_p9), %v402_v42, 256 }
  0x13   : > { %v357_v12 = vld [vmem:[%s1591_s2 + $0x20] sm:$0xff] (!%p302_p9)  ;;  %v433_v13 = vld [vmem:[%s1592_s3 + $0x28] sm:$0xff] (!%p302_p9)  ;;  %v521_v16 = vld [vmem:[%s1593_s4 + $0x10] sm:$0xff] (!%p302_p9)  ;;  %v404_v46 = vsub.s32 (!%p302_p9), 0, %v1452_v43  ;;  %v408_v49 = vsub.s32 (!%p302_p9), 1, %v1452_v43  ;;  %s339_s25 = scalar_lea.vmem (!%p302_p9), [#allocation3], %s1010_s23 }
  0x14   : > { %v432_v14 = vld [vmem:[%s1592_s3 + $0x20] sm:$0xff] (!%p302_p9)  ;;  %v360_v17 = vld [vmem:[%s1591_s2 + $0x38] sm:$0xff] (!%p302_p9)  ;;  %v359_v18 = vld [vmem:[%s1591_s2 + $0x30] sm:$0xff] (!%p302_p9)  ;;  %s941_s26 = sshll.u32 (!%p302_p9), %s339_s25, 4  ;;  %s1549_s26 = int_to_ptr.vmem [resolvable:$true] %s941_s26 }
  0x15   : > { %443 = vperm.xlu1 (!%p302_p9), %1094, %v429_v3   ;;  %368 = vperm.xlu0 (!%p302_p9), %1093, %v354_v4   ;;  %v435_v19 = vld [vmem:[%s1592_s3 + $0x38] sm:$0xff] (!%p302_p9)  ;;  %v434_v20 = vld [vmem:[%s1592_s3 + $0x30] sm:$0xff] (!%p302_p9)  ;;  %v524_v21 = vld [vmem:[%s1593_s4 + $0x28] sm:$0xff] (!%p302_p9)  ;;  %s1159_s10 = scalar_lea.vmem (!%p302_p9), %s1549_s26, 32 }
  0x16   : > { %v523_v22 = vld [vmem:[%s1593_s4 + $0x20] sm:$0xff] (!%p302_p9)  ;;  %v526_v23 = vld [vmem:[%s1593_s4 + $0x38] sm:$0xff] (!%p302_p9)  ;;  %v525_v24 = vld [vmem:[%s1593_s4 + $0x30] sm:$0xff] (!%p302_p9)  ;;  %p1160_p11 = scmp.ne.s32.totalorder (!%p302_p9), %s1549_s26, %s1159_s10 }
  0x17   : > { %v608_v25 = vld [vmem:[%s1595_s6 + $0x8] sm:$0xff]  ;;  %v607_v26 = vld [vmem:[%s1595_s6] sm:$0xff]  ;;  %v610_v27 = vld [vmem:[%s1595_s6 + $0x18] sm:$0xff]  ;;  %s1606_s24 = smov (!%p341_p10, %s1011_s24), 7 }
  0x18   : > { %v609_v28 = vld [vmem:[%s1595_s6 + $0x10] sm:$0xff]  ;;  %v612_v29 = vld [vmem:[%s1595_s6 + $0x28] sm:$0xff]  ;;  %v611_v30 = vld [vmem:[%s1595_s6 + $0x20] sm:$0xff]  ;;  %s348_s27 = scalar_lea.vmem %s1590_s1, %s1606_s24  ;;  %s343_s30 = scalar_lea.vmem %s1589_s0, %s1606_s24 }
  0x19   : > { %378 = vperm.xlu1 %1094, %v356_v5   ;;  %373 = vperm.xlu0 %1093, %v355_v6   ;;  %v614_v31 = vld [vmem:[%s1595_s6 + $0x38] sm:$0xff]  ;;  %v613_v32 = vld [vmem:[%s1595_s6 + $0x30] sm:$0xff]  ;;  %v810_v33 = vld [vmem:[%s1596_s7 + $0x8] sm:$0xff]  ;;  %s1026_s24 = sshll.u32 %s1301_s8, 5  ;;  %p1161_p12 = pnand %p1160_p11, %p1318_p5 }
  0x1a   : > { %v809_v34 = vld [vmem:[%s1596_s7] sm:$0xff]  ;;  %v812_v35 = vld [vmem:[%s1596_s7 + $0x18] sm:$0xff]  ;;  %v811_v36 = vld [vmem:[%s1596_s7 + $0x10] sm:$0xff]  ;;  %s1547_s29 = scalar_lea.hbm %s1598_s9, %s1026_s24  ;;  %s1226_s8 = smov [#allocation3]  }
  0x1b   : > { %v814_v38 = vld [vmem:[%s1596_s7 + $0x28] sm:$0xff]  ;;  %v813_v39 = vld [vmem:[%s1596_s7 + $0x20] sm:$0xff]  ;;  %v816_v40 = vld [vmem:[%s1596_s7 + $0x38] sm:$0xff]  ;;  %p1162_p13 = pneg %p1161_p12  ;;  %s1163_s15 = sshll.u32 %s1226_s8, 4  ;;  %s1164_s15 = int_to_ptr.vmem [resolvable:$false] %s1163_s15 }
  0x1c   : > { %v815_v41 = vld [vmem:[%s1596_s7 + $0x30] sm:$0xff]  ;;  %v352_v47 = vld [vmem:[%s348_s27] sm:$0x3]  ;;  %s1165_s17 = scalar_lea.vmem %s1164_s15, 64  ;;  %p1166_p0 = scmp.lt.s32.totalorder %s1549_s26, %s1164_s15 }
  0x1d   : > { %453 = vperm.xlu1 %1094, %v431_v7   ;;  %448 = vperm.xlu0 %1093, %v430_v8   ;;  %v351_v48 = vld [vmem:[%s343_s30] sm:$0x3]  ;;  %v1462_v52 = vrot.slane %v352_v47, %v404_v46  ;;  %v1466_v54 = vrot.slane %v352_v47, %v408_v49  ;;  %s927_s30 = scalar_lea.sflag [#allocation4], %s337_s22  ;;  %p1167_p1 = scmp.lt.s32.totalorder %s1165_s17, %s1159_s10 }
  0x1e   : > { %v1464_v53 = vrot.slane %v351_v48, %v404_v46  ;;  %v1468_v55 = vrot.slane %v351_v48, %v408_v49 }
  0x1f   : > { %p1168_p2 = por %p1167_p1, %p1166_p0 }
  0x21   : > { %534 = vperm.xlu1 %1094, %v520_v9   ;;  %529 = vperm.xlu0 %1093, %v519_v10   ;;  %p1169_p3 = pnand %p1168_p2, %p1162_p13 }
  0x25   : > { %388 = vperm.xlu1 %1094, %v358_v11   ;;  %383 = vperm.xlu0 %1093, %v357_v12  }
  0x29   : > { %463 = vperm.xlu1 %1094, %v433_v13   ;;  %458 = vperm.xlu0 %1093, %v432_v14  }
  0x2d   : > { %544 = vperm.xlu1 %1094, %v522_v15   ;;  %539 = vperm.xlu0 %1093, %v521_v16  }
  0x31   : > { %398 = vperm.xlu1 %1094, %v360_v17   ;;  %393 = vperm.xlu0 %1093, %v359_v18  }
  0x35   : > { %473 = vperm.xlu1 %1094, %v435_v19   ;;  %468 = vperm.xlu0 %1093, %v434_v20  }
  0x39   : > { %554 = vperm.xlu1 %1094, %v524_v21   ;;  %549 = vperm.xlu0 %1093, %v523_v22  }
  0x3d   : > { %564 = vperm.xlu1 %1094, %v526_v23   ;;  %559 = vperm.xlu0 %1093, %v525_v24  }
  0x41   : > { %622 = vperm.xlu1 %1094, %v608_v25   ;;  %617 = vperm.xlu0 %1093, %v607_v26  }
  0x45   : > { %632 = vperm.xlu1 %1094, %v610_v27   ;;  %627 = vperm.xlu0 %1093, %v609_v28  }
  0x49   : > { %642 = vperm.xlu1 %1094, %v612_v29   ;;  %637 = vperm.xlu0 %1093, %v611_v30  }
  0x4d   : > { %652 = vperm.xlu1 %1094, %v614_v31   ;;  %647 = vperm.xlu0 %1093, %v613_v32  }
  0x51   : > { %824 = vperm.xlu1 %1094, %v810_v33   ;;  %819 = vperm.xlu0 %1093, %v809_v34  }
  0x55   : > { %834 = vperm.xlu1 %1094, %v812_v35   ;;  %829 = vperm.xlu0 %1093, %v811_v36  }
  0x59   : > { %844 = vperm.xlu1 %1094, %v814_v38   ;;  %839 = vperm.xlu0 %1093, %v813_v39  }
  0x5d   : > { %854 = vperm.xlu1 %1094, %v816_v40   ;;  %849 = vperm.xlu0 %1093, %v815_v41  }
  0x90   : > { %v439_v44 = vpop.permute.xlu1 %438  ;;  %v364_v45 = vpop.permute.xlu0 %363 }
  0x91   : > { %v487_v58 = vmul.f32 %v1462_v52, %v439_v44  ;;  %v412_v59 = vmul.f32 %v1464_v53, %v364_v45  ;;  %v488_v0 = vmul.f32 %v1466_v54, %v439_v44  ;;  %v413_v1 = vmul.f32 %v1468_v55, %v364_v45 }
  0x93   : > { %v503_v6 = vadd.f32 %v487_v58, %v412_v59  ;;  %v504_v9 = vadd.f32 %v488_v0, %v413_v1 }
  0x94   : > { %v444_v50 = vpop.permute.xlu1 %443  ;;  %v369_v51 = vpop.permute.xlu0 %368 }
  0x95   : > { %v489_v60 = vmul.f32 %v1462_v52, %v444_v50  ;;  %v490_v61 = vmul.f32 %v1466_v54, %v444_v50  ;;  %v414_v62 = vmul.f32 %v1464_v53, %v369_v51  ;;  %v415_v63 = vmul.f32 %v1468_v55, %v369_v51 }
  0x97   : > { %v505_v4 = vadd.f32 %v489_v60, %v414_v62  ;;  %v506_v5 = vadd.f32 %v490_v61, %v415_v63 }
  0x98   : > { %v379_v56 = vpop.permute.xlu1 %378  ;;  %v374_v57 = vpop.permute.xlu0 %373 }
  0x99   : > { %v418_v22 = vmul.f32 %v1464_v53, %v379_v56  ;;  %v419_v23 = vmul.f32 %v1468_v55, %v379_v56  ;;  %v416_v24 = vmul.f32 %v1464_v53, %v374_v57  ;;  %v417_v25 = vmul.f32 %v1468_v55, %v374_v57 }
  0x9c   : > { %v454_v2 = vpop.permute.xlu1 %453  ;;  %v449_v3 = vpop.permute.xlu0 %448 }
  0x9d   : > { %v493_v16 = vmul.f32 %v1462_v52, %v454_v2  ;;  %v494_v17 = vmul.f32 %v1466_v54, %v454_v2  ;;  %v491_v18 = vmul.f32 %v1462_v52, %v449_v3  ;;  %v492_v19 = vmul.f32 %v1466_v54, %v449_v3 }
  0x9f   : > { %v509_v26 = vadd.f32 %v493_v16, %v418_v22  ;;  %v510_v27 = vadd.f32 %v494_v17, %v419_v23  ;;  %v507_v28 = vadd.f32 %v491_v18, %v416_v24  ;;  %v508_v31 = vadd.f32 %v492_v19, %v417_v25 }
  0xa0   : > { %v535_v7 = vpop.permute.xlu1 %534  ;;  %v530_v8 = vpop.permute.xlu0 %529 }
  0xa1   : > { %v569_v10 = vadd.f32 %v535_v7, %v505_v4  ;;  %v570_v11 = vadd.f32 %v535_v7, %v506_v5  ;;  %v567_v12 = vadd.f32 %v530_v8, %v503_v6  ;;  %v568_v13 = vadd.f32 %v530_v8, %v504_v9 }
  0xa3   : > { %1095 = vtanh.f32 %v569_v10 }
  0xa4   : > { %1097 = vtanh.f32 %v570_v11  ;;  %v389_v14 = vpop.permute.xlu1 %388  ;;  %v384_v15 = vpop.permute.xlu0 %383 }
  0xa5   : > { %1099 = vtanh.f32 %v567_v12  ;;  %v422_v50 = vmul.f32 %v1464_v53, %v389_v14  ;;  %v423_v51 = vmul.f32 %v1468_v55, %v389_v14  ;;  %v420_v59 = vmul.f32 %v1464_v53, %v384_v15 }
  0xa6   : > { %1101 = vtanh.f32 %v568_v13  ;;  %v421_v60 = vmul.f32 %v1468_v55, %v384_v15 }
  0xa8   : > { %v464_v20 = vpop.permute.xlu1 %463  ;;  %v459_v21 = vpop.permute.xlu0 %458 }
  0xa9   : > { %v497_v46 = vmul.f32 %v1462_v52, %v464_v20  ;;  %v498_v47 = vmul.f32 %v1466_v54, %v464_v20  ;;  %v495_v49 = vmul.f32 %v1462_v52, %v459_v21  ;;  %v496_v56 = vmul.f32 %v1466_v54, %v459_v21 }
  0xab   : > { %v513_v61 = vadd.f32 %v497_v46, %v422_v50  ;;  %v514_v62 = vadd.f32 %v498_v47, %v423_v51  ;;  %v511_v2 = vadd.f32 %v495_v49, %v420_v59  ;;  %v512_v8 = vadd.f32 %v496_v56, %v421_v60  ;;  %v601_v46 = vld [vmem:[%s1594_s5 + $0x10] sm:$0xff]  ;;  %v606_v49 = vld [vmem:[%s1594_s5 + $0x38] sm:$0xff] }
  0xac   : > { %v545_v29 = vpop.permute.xlu1 %544  ;;  %v540_v30 = vpop.permute.xlu0 %539  ;;  %v605_v47 = vld [vmem:[%s1594_s5 + $0x30] sm:$0xff] }
  0xad   : > { %v1096_v32 = vpop.eup %1095  ;;  %v573_v33 = vadd.f32 %v545_v29, %v509_v26  ;;  %v574_v34 = vadd.f32 %v545_v29, %v510_v27  ;;  %v571_v35 = vadd.f32 %v540_v30, %v507_v28  ;;  %v572_v38 = vadd.f32 %v540_v30, %v508_v31 }
  0xae   : > { %v1098_v36 = vpop.eup %1097 }
  0xaf   : > { %v1100_v39 = vpop.eup %1099  ;;  %1103 = vtanh.f32 %v573_v33 }
  0xb0   : > { %v1102_v40 = vpop.eup %1101  ;;  %1105 = vtanh.f32 %v574_v34  ;;  %v399_v41 = vpop.permute.xlu1 %398  ;;  %v1029_v45 = vpack.c.bf16 %v1096_v32, %v1100_v39 }
  0xb1   : > { %v394_v44 = vpop.permute.xlu0 %393  ;;  %1107 = vtanh.f32 %v571_v35  ;;  %v1027_v48 = vpack.c.bf16 %v1098_v36, %v1102_v40  ;;  %v426_v3 = vmul.f32 %v1464_v53, %v399_v41  ;;  %v427_v4 = vmul.f32 %v1468_v55, %v399_v41  ;;  %v599_v40 = vld [vmem:[%s1594_s5] sm:$0xff] }
  0xb2   : > { %1109 = vtanh.f32 %v572_v38  ;;  %v424_v10 = vmul.f32 %v1464_v53, %v394_v44  ;;  %v425_v15 = vmul.f32 %v1468_v55, %v394_v44  ;;  %v603_v41 = vld [vmem:[%s1594_s5 + $0x20] sm:$0xff]  ;;  %v600_v44 = vld [vmem:[%s1594_s5 + $0x8] sm:$0xff] }
  0xb3   : > { %1028 = vmatprep.subr.bf16.mxu0 %v1027_v48  ;;  %1043 = vmatprep.subr.bf16.mxu1 %v1027_v48  ;;  %v602_v48 = vld [vmem:[%s1594_s5 + $0x18] sm:$0xff] }
  0xb4   : > { %v474_v57 = vpop.permute.xlu1 %473  ;;  %1030 = vmatpush1.bf16.msra.mxu0 %v1029_v45  ;;  %1047 = vmatpush1.bf16.msra.mxu1 %v1029_v45  ;;  %v604_v45 = vld [vmem:[%s1594_s5 + $0x28] sm:$0xff] }
  0xb5   : > { %v469_v58 = vpop.permute.xlu0 %468  ;;  %v501_v63 = vmul.f32 %v1462_v52, %v474_v57  ;;  %v502_v0 = vmul.f32 %v1466_v54, %v474_v57 }
  0xb6   : > { %v499_v1 = vmul.f32 %v1462_v52, %v469_v58  ;;  %v500_v5 = vmul.f32 %v1466_v54, %v469_v58 }
  0xb7   : > { %v517_v17 = vadd.f32 %v501_v63, %v426_v3  ;;  %v518_v18 = vadd.f32 %v502_v0, %v427_v4 }
  0xb8   : > { %v555_v6 = vpop.permute.xlu1 %554  ;;  %v515_v19 = vadd.f32 %v499_v1, %v424_v10  ;;  %v516_v22 = vadd.f32 %v500_v5, %v425_v15 }
  0xb9   : > { %v550_v7 = vpop.permute.xlu0 %549  ;;  %v1104_v9 = vpop.eup %1103  ;;  %v577_v11 = vadd.f32 %v555_v6, %v513_v61  ;;  %v578_v12 = vadd.f32 %v555_v6, %v514_v62 }
  0xba   : > { %v575_v13 = vadd.f32 %v550_v7, %v511_v2  ;;  %v1106_v14 = vpop.eup %1105  ;;  %v576_v52 = vadd.f32 %v550_v7, %v512_v8 }
  0xbb   : > { %v1108_v16 = vpop.eup %1107  ;;  %1111 = vtanh.f32 %v577_v11 }
  0xbc   : > { %v1110_v20 = vpop.eup %1109  ;;  %1113 = vtanh.f32 %v578_v12  ;;  %v565_v54 = vpop.permute.xlu1 %564  ;;  %v1033_v23 = vpack.c.bf16 %v1104_v9, %v1108_v16 }
  0xbd   : > { %v560_v21 = vpop.permute.xlu0 %559  ;;  %1115 = vtanh.f32 %v575_v13  ;;  %v581_v53 = vadd.f32 %v565_v54, %v517_v17  ;;  %v582_v24 = vadd.f32 %v565_v54, %v518_v18  ;;  %v1031_v27 = vpack.c.bf16 %v1106_v14, %v1110_v20 }
  0xbe   : > { %v579_v25 = vadd.f32 %v560_v21, %v515_v19  ;;  %1117 = vtanh.f32 %v576_v52  ;;  %v580_v26 = vadd.f32 %v560_v21, %v516_v22 }
  0xbf   : > { %1119 = vtanh.f32 %v581_v53  ;;  %1032 = vmatprep.subr.bf16.mxu0 %v1031_v27  ;;  %1044 = vmatprep.subr.bf16.mxu1 %v1031_v27 }
  0xc0   : > { %1121 = vtanh.f32 %v582_v24  ;;  %1034 = vmatpush1.bf16.msra.mxu0 %v1033_v23  ;;  %1048 = vmatpush1.bf16.msra.mxu1 %v1033_v23  ;;  %v623_v51 = vpop.permute.xlu1 %622 }
  0xc1   : > { %1123 = vtanh.f32 %v579_v25  ;;  %v618_v50 = vpop.permute.xlu0 %617 }
  0xc2   : > { %1125 = vtanh.f32 %v580_v26 }
  0xc4   : > { %v633_v57 = vpop.permute.xlu1 %632 }
  0xc5   : > { %v1112_v55 = vpop.eup %1111  ;;  %v628_v56 = vpop.permute.xlu0 %627 }
  0xc6   : > { %v1114_v28 = vpop.eup %1113 }
  0xc7   : > { %v1116_v29 = vpop.eup %1115 }
  0xc8   : > { %v1118_v30 = vpop.eup %1117  ;;  %v1037_v31 = vpack.c.bf16 %v1112_v55, %v1116_v29  ;;  %v643_v59 = vpop.permute.xlu1 %642 }
  0xc9   : > { %v1120_v32 = vpop.eup %1119  ;;  %v1035_v33 = vpack.c.bf16 %v1114_v28, %v1118_v30  ;;  %v638_v58 = vpop.permute.xlu0 %637 }
  0xca   : > { %v1122_v34 = vpop.eup %1121 }
  0xcb   : > { %v1124_v35 = vpop.eup %1123  ;;  %1036 = vmatprep.subr.bf16.mxu0 %v1035_v33  ;;  %1045 = vmatprep.subr.bf16.mxu1 %v1035_v33 }
  0xcc   : > { %v1126_v36 = vpop.eup %1125  ;;  %1038 = vmatpush1.bf16.msra.mxu0 %v1037_v31  ;;  %1049 = vmatpush1.bf16.msra.mxu1 %v1037_v31  ;;  %v1041_v38 = vpack.c.bf16 %v1120_v32, %v1124_v35  ;;  %v653_v8 = vpop.permute.xlu1 %652 }
  0xcd   : > { %v1039_v39 = vpack.c.bf16 %v1122_v34, %v1126_v36  ;;  %v648_v1 = vpop.permute.xlu0 %647 }
  0xcf   : > { %1040 = vmatprep.subr.bf16.mxu0 %v1039_v39  ;;  %1046 = vmatprep.subr.bf16.mxu1 %v1039_v39 }
  0xd0   : > { %1042 = vmatpush1.bf16.msra.mxu0 %v1041_v38  ;;  %1050 = vmatpush1.bf16.msra.mxu1 %v1041_v38  ;;  %v825_v24 = vpop.permute.xlu1 %824 }
  0xd1   : > { %v820_v16 = vpop.permute.xlu0 %819 }
  0xd3   : > { %1013 = vmatmul.mubr.msk.f32.vlgmr.msra.gmra.mrb[0].mxu0 %vm655_vm0, %v599_v40  ;;  %1017 = vmatmul.mubr.msk.f32.vlgmr.msra.gmra.mrb[0].mxu1 %vm655_vm0, %v603_v41 }
  0xd4   : > { %750 = vmatprep.mubr.f32.mxu0 %v1224_v37  ;;  %774 = vmatprep.mubr.f32.mxu1 %v1224_v37  ;;  %v835_v39 = vpop.permute.xlu1 %834 }
  0xd5   : > { %v830_v32 = vpop.permute.xlu0 %829 }
  0xd7   : > { %1014 = vmatmul.mubr.msk.f32.gmra.mrb[2].mxu0 %vm655_vm0, %v600_v44  ;;  %1018 = vmatmul.mubr.msk.f32.gmra.mrb[2].mxu1 %vm655_vm0, %v604_v45 }
  0xd8   : > { %756 = vmatprep.mubr.f32.mxu0 %v1224_v37  ;;  %780 = vmatprep.mubr.f32.mxu1 %v1224_v37 }
  0xdb   : > { %1015 = vmatmul.mubr.msk.f32.gmra.mrb[4].mxu0 %vm655_vm0, %v601_v46  ;;  %1019 = vmatmul.mubr.msk.f32.gmra.mrb[4].mxu1 %vm655_vm0, %v605_v47 }
  0xdc   : > { %762 = vmatprep.mubr.f32.mxu0 %v1224_v37  ;;  %786 = vmatprep.mubr.f32.mxu1 %v1224_v37 }
  0xdf   : > { %1016 = vmatmul.mubr.msk.f32.gmra.mrb[6].mxu0 %vm655_vm0, %v602_v48  ;;  %1020 = vmatmul.mubr.msk.f32.gmra.mrb[6].mxu1 %vm655_vm0, %v606_v49 }
 0x1a6   : > { %v746_v60 = vpop.f32.mrb[0].mxu0  ;;  %v770_v37 = vpop.f32.mrb[0].mxu1 }
 0x1a7   : > { %v747_v61 = vadd.f32 %v746_v60, %v618_v50  ;;  %v748_v62 = vpop.f32.mrb[1].mxu0  ;;  %v772_v63 = vpop.f32.mrb[1].mxu1  ;;  %v771_v9 = vadd.f32 %v770_v37, %v638_v58 }
 0x1a8   : > { %v749_v0 = vadd.f32 %v748_v62, %v618_v50  ;;  %v773_v15 = vadd.f32 %v772_v63, %v638_v58  ;;  %v840_v50 = vpop.permute.xlu0 %839 }
 0x1a9   : > { %1127 = vtanh.f32 %v747_v61 }
 0x1aa   : > { %v752_v2 = vpop.f32.mrb[2].mxu0  ;;  %v776_v3 = vpop.f32.mrb[2].mxu1  ;;  %1129 = vtanh.f32 %v749_v0 }
 0x1ab   : > { %v753_v4 = vadd.f32 %v752_v2, %v623_v51  ;;  %v754_v5 = vpop.f32.mrb[3].mxu0  ;;  %v778_v6 = vpop.f32.mrb[3].mxu1  ;;  %v777_v17 = vadd.f32 %v776_v3, %v643_v59 }
 0x1ac   : > { %v755_v7 = vadd.f32 %v754_v5, %v623_v51  ;;  %v779_v22 = vadd.f32 %v778_v6, %v643_v59  ;;  %v845_v59 = vpop.permute.xlu1 %844  ;;  %v850_v6 = vpop.permute.xlu0 %849 }
 0x1ad   : > { %1131 = vtanh.f32 %v753_v4 }
 0x1ae   : > { %v758_v10 = vpop.f32.mrb[4].mxu0  ;;  %v782_v11 = vpop.f32.mrb[4].mxu1  ;;  %1133 = vtanh.f32 %v755_v7 }
 0x1af   : > { %v759_v12 = vadd.f32 %v758_v10, %v628_v56  ;;  %v760_v13 = vpop.f32.mrb[5].mxu0  ;;  %v784_v14 = vpop.f32.mrb[5].mxu1  ;;  %v783_v25 = vadd.f32 %v782_v11, %v648_v1 }
 0x1b0   : > { %v761_v52 = vadd.f32 %v760_v13, %v628_v56  ;;  %v785_v27 = vadd.f32 %v784_v14, %v648_v1 }
 0x1b1   : > { %1135 = vtanh.f32 %v759_v12  ;;  %v855_v12 = vpop.permute.xlu1 %854 }
 0x1b2   : > { %1137 = vtanh.f32 %v771_v9  ;;  %v764_v18 = vpop.f32.mrb[6].mxu0  ;;  %v788_v19 = vpop.f32.mrb[6].mxu1 }
 0x1b3   : > { %1139 = vtanh.f32 %v761_v52  ;;  %v765_v20 = vadd.f32 %v764_v18, %v633_v57  ;;  %v766_v54 = vpop.f32.mrb[7].mxu0  ;;  %v790_v21 = vpop.f32.mrb[7].mxu1  ;;  %v789_v28 = vadd.f32 %v788_v19, %v653_v8 }
 0x1b4   : > { %1141 = vtanh.f32 %v773_v15  ;;  %v767_v23 = vadd.f32 %v766_v54, %v633_v57  ;;  %v1128_v53 = vpop.eup %1127  ;;  %v791_v33 = vadd.f32 %v790_v21, %v653_v8 }
 0x1b5   : > { %1143 = vtanh.f32 %v765_v20  ;;  %v1130_v26 = vpop.eup %1129  ;;  %v857_v29 = vmul.f32 %v1128_v53, %v820_v16 }
 0x1b6   : > { %1145 = vtanh.f32 %v777_v17  ;;  %v858_v34 = vmul.f32 %v1130_v26, %v820_v16 }
 0x1b7   : > { %v1132_v55 = vpop.eup %1131  ;;  %1147 = vtanh.f32 %v767_v23 }
 0x1b8   : > { %v859_v30 = vmul.f32 %v1132_v55, %v825_v24  ;;  %1149 = vtanh.f32 %v779_v22  ;;  %v1134_v31 = vpop.eup %1133 }
 0x1b9   : > { %1151 = vtanh.f32 %v783_v25  ;;  %v860_v36 = vmul.f32 %v1134_v31, %v825_v24  ;;  %v1225_v25 = vmov 1966171168  }
 0x1ba   : > { %v873_v35 = vadd.f32 %v859_v30, %v857_v29  ;;  %1153 = vtanh.f32 %v785_v27  ;;  %v907_v26 = vunpack.c.l.s4 %v1225_v25 }
 0x1bb   : > { %v1136_v38 = vpop.eup %1135  ;;  %1155 = vtanh.f32 %v789_v28  ;;  %v886_v41 = vadd.f32 %v860_v36, %v858_v34  ;;  %v900_v28 = vstv %s899_s18 }
 0x1bc   : > { %v1138_v40 = vpop.eup %1137  ;;  %v861_v44 = vmul.f32 %v1136_v38, %v830_v32  ;;  %1157 = vtanh.f32 %v791_v33  ;;  %v908_v31 = vunpack.c.0.s8 %v907_v26 }
 0x1bd   : > { %v1140_v45 = vpop.eup %1139  ;;  %v865_v37 = vmul.f32 %v1138_v40, %v840_v50 }
 0x1be   : > { %v1142_v46 = vpop.eup %1141  ;;  %v874_v47 = vadd.f32 %v873_v35, %v861_v44  ;;  %v862_v48 = vmul.f32 %v1140_v45, %v830_v32  ;;  %v911_v35 = vsub.s32 %v908_v31, %v1452_v43 }
 0x1bf   : > { %v1144_v49 = vpop.eup %1143  ;;  %v866_v1 = vmul.f32 %v1142_v46, %v840_v50 }
 0x1c0   : > { %v1146_v51 = vpop.eup %1145  ;;  %v887_v56 = vadd.f32 %v886_v41, %v862_v48  ;;  %v863_v57 = vmul.f32 %v1144_v49, %v835_v39 }
 0x1c1   : > { %v1148_v58 = vpop.eup %1147  ;;  %v867_v2 = vmul.f32 %v1146_v51, %v845_v59 }
 0x1c2   : > { %v1150_v60 = vpop.eup %1149  ;;  %v875_v61 = vadd.f32 %v874_v47, %v863_v57  ;;  %v864_v62 = vmul.f32 %v1148_v58, %v835_v39 }
 0x1c3   : > { %v1152_v63 = vpop.eup %1151  ;;  %v868_v7 = vmul.f32 %v1150_v60, %v845_v59 }
 0x1c4   : > { %v1154_v0 = vpop.eup %1153  ;;  %v876_v3 = vadd.f32 %v875_v61, %v865_v37  ;;  %v888_v4 = vadd.f32 %v887_v56, %v864_v62  ;;  %v869_v8 = vmul.f32 %v1152_v63, %v850_v6 }
 0x1c5   : > { %v1156_v5 = vpop.eup %1155  ;;  %v870_v13 = vmul.f32 %v1154_v0, %v850_v6 }
 0x1c6   : > { %v877_v9 = vadd.f32 %v876_v3, %v867_v2  ;;  %v889_v10 = vadd.f32 %v888_v4, %v866_v1  ;;  %v1158_v11 = vpop.eup %1157  ;;  %v871_v14 = vmul.f32 %v1156_v5, %v855_v12 }
 0x1c7   : > { %v872_v17 = vmul.f32 %v1158_v11, %v855_v12 }
 0x1c8   : > { %v878_v15 = vadd.f32 %v877_v9, %v869_v8  ;;  %v890_v52 = vadd.f32 %v889_v10, %v868_v7 }
 0x1ca   : > { %v879_v16 = vadd.f32 %v878_v15, %v871_v14  ;;  %v891_v18 = vadd.f32 %v890_v52, %v870_v13 }
 0x1cc   : > { %v880_v19 = vrot.slane %v879_v16, 4  ;;  %v892_v20 = vadd.f32 %v891_v18, %v872_v17 }
 0x1ce   : > { %v881_v54 = vadd.f32 %v880_v19, %v879_v16  ;;  %v893_v21 = vrot.slane %v892_v20, 4 }
 0x1d0   : > { %v882_v22 = vrot.slane %v881_v54, 2  ;;  %v894_v23 = vadd.f32 %v893_v21, %v892_v20 }
 0x1d2   : > { %v895_v53 = vrot.slane %v894_v23, 2  ;;  %v883_v24 = vadd.f32 %v882_v22, %v881_v54 }
 0x1d4   : > { %v884_v27 = vrot.slane %v883_v24, 1  ;;  %v896_v55 = vadd.f32 %v895_v53, %v894_v23 }
 0x1d6   : > { %v885_v29 = vadd.f32 %v884_v27, %v883_v24  ;;  %v897_v30 = vrot.slane %v896_v55, 1 }
 0x1d8   : > { %v898_v32 = vadd.f32 %v897_v30, %v896_v55  ;;  %v901_v33 = vadd.f32 %v900_v28, %v885_v29 }
 0x1da   : > { %v902_v34 = vadd.f32 %v900_v28, %v898_v32 }
 0x1dc   : > { %v905_v36 = vcombine.low %v901_v33, %v902_v34 }
 0x1de   : > { %v912_v38 = vrot.slane %v905_v36, %v911_v35 }
 0x1e0   : > { %v919_v39 = vrot.slane %v912_v38, %v911_v35 }
 0x1e2   : > { %925 = vst.msk [vmem:[%s339_s25] sm:$0x3] %vm923_vm1, %v919_v39 }
 0x1e3   : > { %1172 = shalt.err (!%p1169_p3)
}
 0x1e4   : > { %s1173_s18 = scalar_lea.hbm %s1547_s29, 32  ;;  %s1177_s24 = scalar_lea.hbm %s1598_s9, 128 }
 0x1e5   : > { %p1174_p4 = scmp.ne.s32.totalorder %s1547_s29, %s1173_s18  ;;  %p1178_p9 = scmp.lt.u32.totalorder %s1547_s29, %s1598_s9 }
 0x1e6   : > { %p1179_p10 = scmp.lt.u32.totalorder %s1177_s24, %s1173_s18  ;;  %p1181_p12 = scmp.lt.u32.totalorder %s1173_s18, %s1547_s29 }
 0x1e7   : > { %p1175_p7 = pnand %p1174_p4, %p1318_p5 }
 0x1e8   : > { %p1180_p11 = por %p1179_p10, %p1178_p9 }
 0x1e9   : > { %p1176_p8 = pneg %p1175_p7 }
 0x1ea   : > { %p1182_p13 = por %p1181_p12, %p1180_p11 }
 0x1ec   : > { %p1183_p0 = pnand %p1182_p13, %p1176_p8 }
 0x1ee   : > { %1186 = shalt.err (!%p1183_p0)
}
 0x1ef   : > { %1051 = dma.vmem_to_hbm [thread:$0]  (%p1318_p5), %s1549_s26, 32, %s1547_s29, %s927_s30  }
 0x1f0 PF: > { %p1057_p1 = scmp.ge.s32.totalorder %s1221_s14, 2  ;;  %s953_s28 = sand.u32 1, %s1209_s11  }
 0x1f1   : > { %s954_s10 = scalar_lea.sflag [#allocation4], %s953_s28 }
 0x1f2   : > { %p1054_p2 = pnand %p1057_p1, %p1322_p6 }
 0x1f4   : > { %1204 = dma.done.wait (!%p1054_p2), %s954_s10, 32  }
 0x1f5   : > { %1206 = vsyncadd (!%p1054_p2), %s954_s10, 4294967264  ;;  %p20_p3 = scmp.ge.s32.totalorder %s1305_s16, 6   ;;  %s1601_s11 = smov %s1213_s12 }
 0x1f6   : > { %s1602_s12 = smov %s1217_s13  ;;  %s1603_s13 = smov %s1316_s19 }
 0x1f7   : > { %s1604_s14 = smov %s1305_s16  ;;  %22 = sbr.rel (!%p20_p3) target bundleno = 5 (0x5), region = 94 }
 0x1fe   :  { %959 = vsyncpa [#allocation4], 1 }
 0x1ff   :  { %961 = vsyncpa [#allocation4 + $0x1], 1 }

</bundles_post_ra>
